<compile_context>
chip_gen: v6e
topology: v6e:2x2x1
jax: 0.10.0
libtpu: 0.0.40
codegen_flags: <defaults>
</compile_context>

<pallas_src>
import functools
import numpy as np
import jax
import jax.numpy as jnp
from jax import lax
from jax.experimental import pallas as pl
from jax.experimental.pallas import tpu as pltpu


# ----------------------------------------------------------------------------
# small helpers
# ----------------------------------------------------------------------------
def _round_up(a, b):
    return ((a + b - 1) // b) * b


def _l2normalize(v, eps=1e-12):
    return v / (jnp.sqrt(jnp.sum(v * v)) + eps)


def spectral_normalize(w_bar, u, v, power_iterations=1, eps=1e-12):
    """PyTorch SpectralNorm._update_u_v, hoisted to plain JAX (tiny problem).

    Returns (w_bar / sigma, u_new, v_new). sigma uses the *updated* u, v,
    matching the PyTorch code path.
    """
    height = w_bar.shape[0]
    wf = w_bar.reshape(height, -1)
    for _ in range(power_iterations):
        v = _l2normalize(wf.T @ u, eps)
        u = _l2normalize(wf @ v, eps)
    sigma = jnp.dot(u, wf @ v)
    return w_bar / sigma, u, v


# ----------------------------------------------------------------------------
# Pallas kernel: fused dual conv-matmul + bias + sigmoid gate + activation
# ----------------------------------------------------------------------------
def _gated_conv_kernel(p_ref, w_ref, b_ref, o_ref, *, coutp, activation,
                       neg_slope):
    # (TM, K) bf16 @ (K, 2*Coutp) bf16 -> f32 accumulation on the MXU.
    # K need not be 128-aligned; Mosaic masks the padded contraction lanes.
    y = jnp.dot(p_ref[...], w_ref[...], preferred_element_type=jnp.float32)
    y = y + b_ref[...]                       # (1, 2*Coutp) bias broadcast, f32

    conv = y[:, :coutp]                      # lane-aligned (128-multiple) slices
    mask = y[:, coutp:]
    gated = conv * jax.nn.sigmoid(mask)      # sigmoid on EUP, mul on VPU (f32)

    # Post-matmul math stays f32 (v5e VPU/EUP have no bf16 path).
    if activation == 'lrelu':
        out = jnp.where(gated >= 0, gated, neg_slope * gated)
    elif activation == 'relu':
        out = jnp.maximum(gated, 0.0)
    elif activation == 'tanh':
        out = jnp.tanh(gated)
    elif activation == 'sigmoid':
        out = jax.nn.sigmoid(gated)
    elif activation == 'selu':
        out = 1.0507009873554805 * jnp.where(
            gated > 0, gated, 1.6732632423543772 * (jnp.exp(gated) - 1.0))
    elif activation == 'none':
        out = gated
    else:
        raise NotImplementedError(f"activation={activation}")
    o_ref[...] = out.astype(o_ref.dtype)     # lane-dense store (Coutp % 128 == 0)


# ----------------------------------------------------------------------------
# wrapper
# ----------------------------------------------------------------------------
def gated_conv2d(x, w_conv, b_conv, w_mask, b_mask, *,
                 stride=1, padding=0, dilation=1,
                 pad_type='reflect', activation='lrelu', norm='none',
                 neg_slope=0.2, tile_m=1024, mxu_dtype=jnp.bfloat16,
                 out_dtype=jnp.bfloat16, out_format='NHWC'):
    """Forward of GatedConv2d (weights already spectral-normalized if sn=True).

    x: (N, Cin, H, W); w_*: (Cout, Cin, KH, KW); b_*: (Cout,).
    Returns NHWC by default (avoids a full-tensor transpose pass); pass
    out_format='NCHW' for PyTorch layout.  For tight f32 parity runs set
    mxu_dtype=out_dtype=jnp.float32.
    """
    assert norm == 'none', "TODO(synk): bn/in/ln not fused (module default is 'none')"
    N, Cin, H, W = x.shape
    Cout, _, KH, KW = w_conv.shape

    # --- NHWC + matmul dtype BEFORE pad/im2col: halves staging traffic, and the
    #     reflect/edge pad is a pure copy so casting early loses nothing. --------
    xh = jnp.transpose(x, (0, 2, 3, 1)).astype(mxu_dtype)
    if padding > 0:
        mode = {'reflect': 'reflect', 'replicate': 'edge', 'zero': 'constant'}[pad_type]
        xh = jnp.pad(xh, ((0, 0), (padding, padding), (padding, padding), (0, 0)),
                     mode=mode)
    Hp, Wp = H + 2 * padding, W + 2 * padding
    Ho = (Hp - dilation * (KH - 1) - 1) // stride + 1
    Wo = (Wp - dilation * (KW - 1) - 1) // stride + 1

    # --- im2col (wrapper / XLA), unpadded K, column order k = (i*KW + j)*Cin + c
    #     (weights below are packed to the same order). -------------------------
    K = Cin * KH * KW
    cols = []
    for i in range(KH):
        for j in range(KW):
            hi, wi = i * dilation, j * dilation
            cols.append(xh[:, hi:hi + (Ho - 1) * stride + 1:stride,
                              wi:wi + (Wo - 1) * stride + 1:stride, :])
    patches = jnp.concatenate(cols, axis=-1).reshape(N * Ho * Wo, K)   # bf16, (M, K)

    # --- tiling / padding ------------------------------------------------------
    M = N * Ho * Wo
    Coutp = _round_up(Cout, 128)          # lane-dense output (unmasked vst)
    C2 = 2 * Coutp
    in_bytes = np.dtype(mxu_dtype).itemsize
    out_bytes = np.dtype(out_dtype).itemsize

    # TM: as big as VMEM allows (mem-bound roofline), but keep the whole
    # double-buffered footprint under ~24 MiB (v7x: 64 MiB VMEM, 32 MiB scoped
    # default) and leave >= ~8 grid steps so ("parallel",) feeds both TCs.
    weight_vmem = 2 * K * C2 * in_bytes                       # assume 2 buffers
    per_row = 2 * (K * in_bytes + Coutp * out_bytes)          # dbl-buffered streams
    budget = 24 * 1024 * 1024
    tm_budget = max(16, (budget - weight_vmem) // max(per_row, 1))
    TM = min(int(tile_m), int(tm_budget), _round_up(-(-M // 8), 16))
    TM = max(16, (TM // 16) * 16)
    Mp = _round_up(M, TM)
    patches_p = patches if Mp == M else jnp.pad(patches, ((0, Mp - M), (0, 0)))

    # --- pack weights: (K, Coutp) each, conv|mask concatenated -----------------
    def _pack(w, b):
        wf = jnp.transpose(w, (2, 3, 1, 0)).reshape(K, Cout).astype(jnp.float32)
        wp = jnp.pad(wf, ((0, 0), (0, Coutp - Cout)))
        bp = jnp.pad(b.astype(jnp.float32), (0, Coutp - Cout))
        return wp, bp

    wc, bc = _pack(w_conv, b_conv)
    wm, bm = _pack(w_mask, b_mask)
    w_all = jnp.concatenate([wc, wm], axis=1).astype(mxu_dtype)   # (K, 2*Coutp)
    b_all = jnp.concatenate([bc, bm]).reshape(1, C2)              # f32

    kernel = functools.partial(_gated_conv_kernel, coutp=Coutp,
                               activation=activation, neg_slope=neg_slope)

    vmem_need = weight_vmem + TM * per_row + C2 * 4 + (2 << 20)
    vmem_limit = int(min(max(32 << 20, vmem_need), 60 << 20))

    y_pad = pl.pallas_call(
        kernel,
        out_shape=jax.ShapeDtypeStruct((Mp, Coutp), out_dtype),
        grid=(Mp // TM,),
        in_specs=[
            pl.BlockSpec((TM, K), lambda i: (i, 0)),     # streaming patch tile
            pl.BlockSpec((K, C2), lambda i: (0, 0)),     # fused conv+mask weights
            pl.BlockSpec((1, C2), lambda i: (0, 0)),     # fused biases (f32)
        ],
        out_specs=pl.BlockSpec((TM, Coutp), lambda i: (i, 0)),
        compiler_params=pltpu.CompilerParams(
            dimension_semantics=("parallel",),           # independent M tiles
            vmem_limit_bytes=vmem_limit),
    )(patches_p, w_all, b_all)

    y = y_pad[:M, :Cout].reshape(N, Ho, Wo, Cout)        # NHWC straight from kernel
    if out_format == 'NCHW':
        y = jnp.transpose(y, (0, 3, 1, 2))
    return y


# ----------------------------------------------------------------------------
# plain-JAX reference (PyTorch GatedConv2d forward, norm='none', lrelu)
# ----------------------------------------------------------------------------
def _reference(x, w_conv, b_conv, w_mask, b_mask, *, padding, pad_type='reflect',
               stride=1, dilation=1, neg_slope=0.2):
    mode = {'reflect': 'reflect', 'replicate': 'edge', 'zero': 'constant'}[pad_type]
    xp = jnp.pad(x, ((0, 0), (0, 0), (padding, padding), (padding, padding)),
                 mode=mode) if padding > 0 else x
    dn = ('NCHW', 'OIHW', 'NCHW')
    conv = lax.conv_general_dilated(xp, w_conv, (stride, stride), 'VALID',
                                    rhs_dilation=(dilation, dilation),
                                    dimension_numbers=dn) + b_conv.reshape(1, -1, 1, 1)
    mask = lax.conv_general_dilated(xp, w_mask, (stride, stride), 'VALID',
                                    rhs_dilation=(dilation, dilation),
                                    dimension_numbers=dn) + b_mask.reshape(1, -1, 1, 1)
    g = conv * jax.nn.sigmoid(mask)                      # activation AFTER the gate,
    return jnp.where(g >= 0, g, neg_slope * g)           # matching the nn.Module


# ----------------------------------------------------------------------------
if __name__ == "__main__":
    key = jax.random.PRNGKey(0)
    ks = jax.random.split(key, 9)

    N, Cin, H, W = 2, 4, 16, 16
    Cout, KH, KW, PAD = 8, 3, 3, 1

    x = jax.random.normal(ks[0], (N, Cin, H, W), dtype=jnp.float32)
    w_conv_bar = jax.random.normal(ks[1], (Cout, Cin, KH, KW), dtype=jnp.float32) * 0.1
    b_conv = jax.random.normal(ks[2], (Cout,), dtype=jnp.float32) * 0.01
    w_mask_bar = jax.random.normal(ks[3], (Cout, Cin, KH, KW), dtype=jnp.float32) * 0.1
    b_mask = jax.random.normal(ks[4], (Cout,), dtype=jnp.float32) * 0.01
    u_c = _l2normalize(jax.random.normal(ks[5], (Cout,), dtype=jnp.float32))
    v_c = _l2normalize(jax.random.normal(ks[6], (Cin * KH * KW,), dtype=jnp.float32))
    u_m = _l2normalize(jax.random.normal(ks[7], (Cout,), dtype=jnp.float32))
    v_m = _l2normalize(jax.random.normal(ks[8], (Cin * KH * KW,), dtype=jnp.float32))

    # ---- sn=False (module defaults: reflect pad, lrelu, norm='none') ----------
    # default fast path: NHWC layout, bf16 output
    y0 = gated_conv2d(x, w_conv_bar, b_conv, w_mask_bar, b_mask,
                      padding=PAD, pad_type='reflect', activation='lrelu')
    y0 = jax.block_until_ready(y0)
    y0_ref = _reference(x, w_conv_bar, b_conv, w_mask_bar, b_mask, padding=PAD)
    np.testing.assert_allclose(
        np.asarray(y0.astype(jnp.float32)),
        np.asarray(jnp.transpose(y0_ref, (0, 2, 3, 1))),
        rtol=2e-2, atol=2e-2)

    # ---- sn=True: power iteration hoisted to plain JAX, conv in the kernel ----
    # also exercise the NCHW / f32-output path
    w_conv_n, _, _ = spectral_normalize(w_conv_bar, u_c, v_c)
    w_mask_n, _, _ = spectral_normalize(w_mask_bar, u_m, v_m)
    y1 = gated_conv2d(x, w_conv_n, b_conv, w_mask_n, b_mask,
                      padding=PAD, pad_type='reflect', activation='lrelu',
                      out_dtype=jnp.float32, out_format='NCHW')
    y1 = jax.block_until_ready(y1)
    y1_ref = _reference(x, w_conv_n, b_conv, w_mask_n, b_mask, padding=PAD)
    np.testing.assert_allclose(np.asarray(y1), np.asarray(y1_ref),
                               rtol=2e-2, atol=2e-2)

    print("KERNEL_OK")
</pallas_src>

<mosaic_0001>
module attributes {stable_mosaic.version = 11 : i64} {
  func.func @_gated_conv_kernel(%arg0: i32, %arg1: memref<64x36xbf16, #tpu.memory_space<vmem>>, %arg2: memref<36x256xbf16, #tpu.memory_space<vmem>>, %arg3: memref<1x256xf32, #tpu.memory_space<vmem>>, %arg4: memref<64x128xbf16, #tpu.memory_space<vmem>>) attributes {dimension_semantics = [#tpu.dimension_semantics<parallel>], iteration_bounds = array<i64: 8>, scalar_prefetch = 0 : i64, scratch_operands = 0 : i64, tpu.core_type = #tpu.core_type<tc>, window_params = [{transform_indices = @transform_0, window_bounds = array<i64: 64, 36>}, {pipeline_mode = #tpu.pipeline_mode<synchronous>, transform_indices = @transform_1, window_bounds = array<i64: 36, 256>}, {pipeline_mode = #tpu.pipeline_mode<synchronous>, transform_indices = @transform_2, window_bounds = array<i64: 1, 256>}, {transform_indices = @transform_3, window_bounds = array<i64: 64, 128>}]} {
    %c0 = arith.constant 0 : index
    %c0_0 = arith.constant 0 : index
    %0 = vector.load %arg1[%c0, %c0_0] : memref<64x36xbf16, #tpu.memory_space<vmem>>, vector<64x36xbf16>
    %c0_1 = arith.constant 0 : index
    %c0_2 = arith.constant 0 : index
    %1 = vector.load %arg2[%c0_1, %c0_2] : memref<36x256xbf16, #tpu.memory_space<vmem>>, vector<36x256xbf16>
    %cst = arith.constant dense<0.000000e+00> : vector<64x256xf32>
    %2 = tpu.matmul %0, %1, %cst {dimension_numbers = #tpu.dot_dimension_numbers<[1], [0], [0], [1], [0, 0, 1, 1], [], []>} : vector<64x36xbf16>, vector<36x256xbf16>, vector<64x256xf32> -> vector<64x256xf32>
    %c0_3 = arith.constant 0 : index
    %c0_4 = arith.constant 0 : index
    %3 = vector.load %arg3[%c0_3, %c0_4] : memref<1x256xf32, #tpu.memory_space<vmem>>, vector<1x256xf32>
    %4 = vector.broadcast %3 : vector<1x256xf32> to vector<64x256xf32>
    %5 = arith.addf %2, %4 : vector<64x256xf32>
    %6 = vector.extract_strided_slice %5 {offsets = [0, 0], sizes = [64, 128], strides = [1, 1]} : vector<64x256xf32> to vector<64x128xf32>
    %7 = vector.extract_strided_slice %5 {offsets = [0, 128], sizes = [64, 128], strides = [1, 1]} : vector<64x256xf32> to vector<64x128xf32>
    %8 = arith.negf %7 : vector<64x128xf32>
    %9 = math.exp %8 : vector<64x128xf32>
    %cst_5 = arith.constant 1.000000e+00 : f32
    %10 = vector.broadcast %cst_5 : f32 to vector<64x128xf32>
    %11 = arith.addf %10, %9 : vector<64x128xf32>
    %12 = arith.divf %10, %11 : vector<64x128xf32>
    %13 = arith.mulf %6, %12 : vector<64x128xf32>
    %cst_6 = arith.constant 0.000000e+00 : f32
    %14 = vector.broadcast %cst_6 : f32 to vector<64x128xf32>
    %15 = arith.cmpf oge, %13, %14 : vector<64x128xf32>
    %cst_7 = arith.constant 2.000000e-01 : f32
    %16 = vector.broadcast %cst_7 : f32 to vector<64x128xf32>
    %17 = arith.mulf %16, %13 : vector<64x128xf32>
    %18 = arith.select %15, %13, %17 : vector<64x128xi1>, vector<64x128xf32>
    %19 = arith.truncf %18 : vector<64x128xf32> to vector<64x128xbf16>
    %c0_8 = arith.constant 0 : index
    %c0_9 = arith.constant 0 : index
    %20 = vector.load %arg4[%c0_8, %c0_9] : memref<64x128xbf16, #tpu.memory_space<vmem>>, vector<64x128xbf16>
    tpu.vector_store %arg4[%c0_8, %c0_9], %19 {strides = array<i32>} : memref<64x128xbf16, #tpu.memory_space<vmem>>, vector<64x128xbf16>,
    return
  }
  func.func @transform_0(%arg0: i32) -> (i32, i32) {
    %c0_i32 = arith.constant 0 : i32
    %c0_i32_0 = arith.constant 0 : i32
    return %arg0, %c0_i32 : i32, i32
  }
  func.func @transform_1(%arg0: i32) -> (i32, i32) {
    %c0_i32 = arith.constant 0 : i32
    %c0_i32_0 = arith.constant 0 : i32
    %c0_i32_1 = arith.constant 0 : i32
    return %c0_i32, %c0_i32_0 : i32, i32
  }
  func.func @transform_2(%arg0: i32) -> (i32, i32) {
    %c0_i32 = arith.constant 0 : i32
    %c0_i32_0 = arith.constant 0 : i32
    %c0_i32_1 = arith.constant 0 : i32
    return %c0_i32, %c0_i32_0 : i32, i32
  }
  func.func @transform_3(%arg0: i32) -> (i32, i32) {
    %c0_i32 = arith.constant 0 : i32
    %c0_i32_0 = arith.constant 0 : i32
    return %arg0, %c0_i32 : i32, i32
  }
}

</mosaic_0001>

<bundles_post_ra>
// kernel: tpu_custom_call.1
= control target key start
LH: loop header
LB: loop body
LE: loop exit
PB: predicated region body
PF: predicated region fallthrough
CT: control target
= control target key end

     0   :  { %8 = vsyncpa [#allocation3], 0  ;;  %s932_s0 = inlined_call_operand.vmem [shape: bf16[512,36], index: 0, kind: input, shape index: {}]   ;;  %s933_s1 = inlined_call_operand.vmem [shape: bf16[36,256], index: 1, kind: input, shape index: {}]   ;;  %s934_s2 = inlined_call_operand.vmem [shape: f32[1,256], index: 2, kind: input, shape index: {}]   ;;  %s935_s3 = inlined_call_operand.hbm [shape: bf16[512,128], index: 3, kind: output, shape index: {}]  }
   0x1   :  { %10 = vsyncpa [#allocation3 + $0x1], 0  ;;  %s785_s12 = smov 0   ;;  %s787_s13 = smov 0  }
   0x2   :  { %s789_s14 = smov 0   ;;  %s791_s15 = smov 0  }
   0x3 LB: > { %s806_s16 = sadd.s32 4294967295, %s759_s15   ;;  %s532_s17 = sadd.s32 4294967294, %s759_s15   ;;  %s759_s15 = sphi %s791_s15, %s941_s15   ;;  %s755_s14 = sphi %s789_s14, %s940_s14   ;;  %s751_s13 = sphi %s787_s13, %s939_s13   ;;  %s747_s12 = sphi %s785_s12, %s938_s12  }
   0x4   : > { %s810_s18 = sadd.s32 1, %s759_s15   ;;  %s91_s19 = sadd.s32 1, %s755_s14 }
   0x5   : > { %s88_s20 = ssub.s32 %s759_s15, %s810_s18  ;;  %p101_p0 = scmp.ne.s32.totalorder %s755_s14, %s751_s13 }
   0x6   : > { %p89_p1 = scmp.eq.s32.totalorder %s88_s20, 0  ;;  %p102_p2 = scmp.eq.s32.totalorder %s806_s16, 7 }
   0x7   : > { %p107_p3 = scmp.ne.s32.totalorder %s751_s13, %s747_s12  ;;  %p108_p4 = scmp.eq.s32.totalorder %s532_s17, 7 }
   0x8   : > { %s821_s21 = scalar_select %p89_p1, %s755_s14, %s91_s19  }
   0x9   : > { %p823_p5 = por %p102_p2, %p101_p0  ;;  %p827_p6 = por %p108_p4, %p107_p3 }
   0xa   : > { %p535_p7 = scmp.ge.s32.totalorder %s759_s15, 1  ;;  %p141_p8 = scmp.lt.s32.totalorder %s759_s15, 9 }
   0xc   : > { %p142_p9 = pnand %p535_p7, %p141_p8 }
   0xd   : > { %s537_s28 = sshll.u32 (!%p142_p9), %s806_s16, 3  ;;  %s162_s20 = sand.u32 (!%p142_p9), 1, %s751_s13  }
   0xe   : > { %145 = sbr.rel (%p142_p9) target bundleno = 297 (0x129), region = 32  ;;  %p166_p10 = scmp.lt.s32.totalorder (!%p142_p9), %s537_s28, 63 }
   0xf   : > { %s536_s24 = sshll.u32 (!%p142_p9), %s162_s20, 5  ;;  %s583_s26 = sshll.u32 (!%p142_p9), %s806_s16, 9 }
  0x10   : > { %s164_s25 = scalar_lea.vmem (!%p142_p9), [#allocation2], %s536_s24  ;;  %s886_s30 = scalar_lea.hbm (!%p142_p9), %s935_s3, %s583_s26 }
  0x11   : > { %s470_s27 = sshll.u32 (!%p142_p9), %s164_s25, 4  ;;  %s892_s16 = scalar_lea.sflag (!%p142_p9), [#allocation3], %s162_s20  ;;  %s888_s27 = int_to_ptr.vmem [resolvable:$true] %s470_s27 }
  0x12   : > { %s699_s4 = scalar_lea.vmem (!%p142_p9), %s888_s27, 512  ;;  %s762_s5 = smov (!%p142_p9), [#allocation2]  }
  0x13   : > { %v185_v0 = vld [vmem:[%s933_s1 + $0x20] sm:$0x33]  ;;  %vm256_vm0 = vcmask 1041408   ;;  %v657_v3 = vld [vmem:[%s933_s1 + $0x14] ss:$8 sps:$4 sm:$0xff]   ;;  %v761_v4 = vmov 0   ;;  %v188_v13 = vlaneseq  ;;  %p700_p11 = scmp.ne.s32.totalorder %s888_s27, %s699_s4 }
  0x14   : > { %v548_v1 = vcombine.high %v185_v0, %v185_v0  ;;  %v547_v2 = vcombine.low %v185_v0, %v185_v0  ;;  %295 = vmatprep.mubr.bf16.mxu0 %v761_v4  ;;  %315 = vmatprep.mubr.bf16.mxu1 %v761_v4  ;;  %v659_v6 = vld [vmem:[%s933_s1 + $0x10] ss:$8 sps:$4 sm:$0xff]   ;;  %s943_s28 = smov (!%p166_p10, %s537_s28), 63  ;;  %v660_v7 = vld [vmem:[%s933_s1 + $0x4] ss:$8 sps:$4 sm:$0xff]   ;;  %vm243_vm1 = vcmask 293888  }
  0x15   : > { %s538_s6 = sshll.u32 %s943_s28, 2  ;;  %v662_v8 = vld [vmem:[%s933_s1] ss:$8 sps:$4 sm:$0xff]   ;;  %v189_v14 = vshrl.u32 %v188_v13, 7  ;;  %p701_p12 = pnand %p700_p11, %p823_p5 }
  0x16   : > { %549 = vmatprep.subr.msk.bf16.mxu0 %vm256_vm0, %v548_v1  ;;  %607 = vmatprep.subr.msk.bf16.mxu1 %vm256_vm0, %v548_v1  ;;  %v258_v5 = vsel %vm256_vm0, %v547_v2, 0  ;;  %s169_s9 = scalar_lea.vmem %s932_s0, %s538_s6  ;;  %v186_v16 = vld [vmem:[%s934_s2] sm:$0x3]  ;;  %s703_s6 = sshll.u32 %s762_s5, 4  ;;  %s704_s6 = int_to_ptr.vmem [resolvable:$false] %s703_s6 }
  0x17   : > { %274 = vmatpush1.bf16.msra.mxu0 %v258_v5  ;;  %610 = vmatpush1.bf16.msra.mxu1 %v258_v5  ;;  %v663_v9 = vld [vmem:[%s169_s9] sm:$0xff]   ;;  %v664_v10 = vld [vmem:[%s169_s9 + $0x10] sm:$0xff]   ;;  %v665_v11 = vld [vmem:[%s169_s9 + $0x8] sm:$0xff]   ;;  %v194_v15 = vsub.s32 1, %v189_v14  ;;  %v190_v58 = vsub.s32 0, %v189_v14  ;;  %p702_p13 = pneg %p701_p12  ;;  %s705_s7 = scalar_lea.vmem %s704_s6, 1024 }
  0x18   : > { %275 = vmatprep.subr.bf16.mxu0 %v657_v3  ;;  %608 = vmatprep.subr.bf16.mxu1 %v657_v3  ;;  %v666_v12 = vld [vmem:[%s169_s9 + $0x18] sm:$0xff]   ;;  %p706_p0 = scmp.lt.s32.totalorder %s888_s27, %s704_s6  ;;  %p707_p1 = scmp.lt.s32.totalorder %s705_s7, %s699_s4 }
  0x19   : > { %v195_v17 = vrot.slane %v186_v16, %v194_v15  ;;  %v191_v63 = vrot.slane %v186_v16, %v190_v58 }
  0x1a   : > { %p708_p2 = por %p707_p1, %p706_p0 }
  0x1b   : > { %276 = vmatpush1.bf16.msra.mxu0 %v659_v6  ;;  %611 = vmatpush1.bf16.msra.mxu1 %v659_v6 }
  0x1c   : > { %277 = vmatprep.subr.bf16.mxu0 %v660_v7  ;;  %609 = vmatprep.subr.bf16.mxu1 %v660_v7  ;;  %p709_p3 = pnand %p708_p2, %p702_p13 }
  0x1f   : > { %278 = vmatpush1.bf16.msra.mxu0 %v662_v8  ;;  %612 = vmatpush1.bf16.msra.mxu1 %v662_v8 }
  0x22   : > { %550 = vmatmul.mubr.msk.bf16.vlgmr.msra.gmra.mxu0 %vm243_vm1, %v663_v9  ;;  %552 = vmatmul.mubr.msk.bf16.vlgmr.msra.gmra.mxu1 %vm243_vm1, %v664_v10 }
  0x23   : > { %305 = vmatprep.mubr.bf16.mxu0 %v761_v4  ;;  %325 = vmatprep.mubr.bf16.mxu1 %v761_v4 }
  0x2a   : > { %551 = vmatmul.mubr.msk.bf16.gmra.mxu0 %vm243_vm1, %v665_v11  ;;  %553 = vmatmul.mubr.msk.bf16.gmra.mxu1 %vm243_vm1, %v666_v12 }
  0xe2   : > { %v855_v18 = vpop.f32.mrf.mxu0  ;;  %v857_v19 = vpop.f32.mrf.mxu1 }
  0xe3   : > { %v298_v4 = vadd.f32 %v855_v18, %v191_v63  ;;  %v318_v6 = vadd.f32 %v857_v19, %v191_v63 }
  0xe4   : > { %v299_v20 = vpop.f32.mrf.mxu0  ;;  %v319_v21 = vpop.f32.mrf.mxu1 }
  0xe5   : > { %v300_v22 = vadd.f32 %v299_v20, %v195_v17  ;;  %v320_v23 = vadd.f32 %v319_v21, %v195_v17 }
  0xe6   : > { %v859_v24 = vpop.f32.mrf.mxu0  ;;  %v861_v25 = vpop.f32.mrf.mxu1 }
  0xe7   : > { %v554_v26 = vmul.f32 -1.442695, %v300_v22  ;;  %v558_v27 = vmul.f32 -1.442695, %v320_v23  ;;  %v302_v10 = vadd.f32 %v859_v24, %v191_v63  ;;  %v322_v12 = vadd.f32 %v861_v25, %v191_v63 }
  0xe8   : > { %v303_v28 = vpop.f32.mrf.mxu0  ;;  %v323_v29 = vpop.f32.mrf.mxu1 }
  0xe9   : > { %667 = vpow2.f32 %v554_v26  ;;  %v304_v30 = vadd.f32 %v303_v28, %v195_v17  ;;  %v324_v31 = vadd.f32 %v323_v29, %v195_v17 }
  0xea   : > { %669 = vpow2.f32 %v558_v27  ;;  %v863_v32 = vpop.f32.mrf.mxu0  ;;  %v865_v33 = vpop.f32.mrf.mxu1 }
  0xeb   : > { %v555_v34 = vmul.f32 -1.442695, %v304_v30  ;;  %v559_v35 = vmul.f32 -1.442695, %v324_v31  ;;  %v308_v19 = vadd.f32 %v863_v32, %v191_v63  ;;  %v328_v22 = vadd.f32 %v865_v33, %v191_v63 }
  0xec   : > { %v309_v36 = vpop.f32.mrf.mxu0  ;;  %v329_v37 = vpop.f32.mrf.mxu1 }
  0xed   : > { %671 = vpow2.f32 %v555_v34  ;;  %v310_v38 = vadd.f32 %v309_v36, %v195_v17  ;;  %v330_v39 = vadd.f32 %v329_v37, %v195_v17 }
  0xee   : > { %673 = vpow2.f32 %v559_v35  ;;  %v867_v40 = vpop.f32.mrf.mxu0  ;;  %v869_v41 = vpop.f32.mrf.mxu1 }
  0xef   : > { %v556_v42 = vmul.f32 -1.442695, %v310_v38  ;;  %v560_v43 = vmul.f32 -1.442695, %v330_v39  ;;  %v312_v31 = vadd.f32 %v867_v40, %v191_v63  ;;  %v332_v32 = vadd.f32 %v869_v41, %v191_v63 }
  0xf0   : > { %v313_v44 = vpop.f32.mrf.mxu0  ;;  %v333_v45 = vpop.f32.mrf.mxu1 }
  0xf1   : > { %675 = vpow2.f32 %v556_v42  ;;  %v314_v46 = vadd.f32 %v313_v44, %v195_v17  ;;  %v334_v47 = vadd.f32 %v333_v45, %v195_v17 }
  0xf2   : > { %677 = vpow2.f32 %v560_v43 }
  0xf3   : > { %v557_v48 = vmul.f32 -1.442695, %v314_v46  ;;  %v561_v49 = vmul.f32 -1.442695, %v334_v47 }
  0xf5   : > { %679 = vpow2.f32 %v557_v48 }
  0xf6   : > { %v668_v50 = vpop.eup %667  ;;  %681 = vpow2.f32 %v561_v49 }
  0xf7   : > { %v670_v51 = vpop.eup %669  ;;  %v360_v52 = vadd.f32 1.0, %v668_v50 }
  0xf8   : > { %v364_v53 = vadd.f32 1.0, %v670_v51 }
  0xf9   : > { %683 = vrcp.f32 %v360_v52 }
  0xfa   : > { %v672_v54 = vpop.eup %671  ;;  %685 = vrcp.f32 %v364_v53 }
  0xfb   : > { %v674_v55 = vpop.eup %673  ;;  %v361_v56 = vadd.f32 1.0, %v672_v54 }
  0xfc   : > { %v365_v57 = vadd.f32 1.0, %v674_v55 }
  0xfd   : > { %687 = vrcp.f32 %v361_v56 }
  0xfe   : > { %v676_v59 = vpop.eup %675  ;;  %689 = vrcp.f32 %v365_v57 }
  0xff   : > { %v678_v60 = vpop.eup %677  ;;  %v362_v61 = vadd.f32 1.0, %v676_v59 }
 0x100   : > { %v366_v62 = vadd.f32 1.0, %v678_v60 }
 0x101   : > { %691 = vrcp.f32 %v362_v61 }
 0x102   : > { %v680_v0 = vpop.eup %679  ;;  %693 = vrcp.f32 %v366_v62 }
 0x103   : > { %v682_v1 = vpop.eup %681  ;;  %v363_v2 = vadd.f32 1.0, %v680_v0 }
 0x104   : > { %v367_v3 = vadd.f32 1.0, %v682_v1 }
 0x105   : > { %695 = vrcp.f32 %v363_v2 }
 0x106   : > { %v684_v5 = vpop.eup %683  ;;  %697 = vrcp.f32 %v367_v3 }
 0x107   : > { %v686_v7 = vpop.eup %685  ;;  %v384_v8 = vmul.f32 %v684_v5, %v298_v4 }
 0x108   : > { %v388_v9 = vmul.f32 %v686_v7, %v318_v6 }
 0x109   : > { %v400_v14 = vmul.f32 0.2, %v384_v8  ;;  %vm392_vm2 = vcmp.ge.f32.partialorder %v384_v8, 0.0 }
 0x10a   : > { %v688_v11 = vpop.eup %687  ;;  %v404_v16 = vmul.f32 0.2, %v388_v9  ;;  %vm396_vm3 = vcmp.ge.f32.partialorder %v388_v9, 0.0 }
 0x10b   : > { %v690_v13 = vpop.eup %689  ;;  %v385_v15 = vmul.f32 %v688_v11, %v302_v10  ;;  %v408_v25 = vsel %vm392_vm2, %v384_v8, %v400_v14 }
 0x10c   : > { %v389_v17 = vmul.f32 %v690_v13, %v322_v12  ;;  %v412_v28 = vsel %vm396_vm3, %v388_v9, %v404_v16 }
 0x10d   : > { %vm393_vm4 = vcmp.ge.f32.partialorder %v385_v15, 0.0  ;;  %v401_v18 = vmul.f32 0.2, %v385_v15 }
 0x10e   : > { %v692_v20 = vpop.eup %691  ;;  %vm397_vm5 = vcmp.ge.f32.partialorder %v389_v17, 0.0  ;;  %v405_v21 = vmul.f32 0.2, %v389_v17 }
 0x10f   : > { %v694_v23 = vpop.eup %693  ;;  %v386_v24 = vmul.f32 %v692_v20, %v308_v19  ;;  %v409_v26 = vsel %vm393_vm4, %v385_v15, %v401_v18 }
 0x110   : > { %v390_v27 = vmul.f32 %v694_v23, %v328_v22  ;;  %v413_v29 = vsel %vm397_vm5, %v389_v17, %v405_v21  ;;  %v587_v30 = vpack.c.bf16 %v409_v26, %v408_v25 }
 0x111   : > { %v597_v34 = vpack.c.bf16 %v413_v29, %v412_v28  ;;  %v402_v37 = vmul.f32 0.2, %v386_v24  ;;  %vm394_vm6 = vcmp.ge.f32.partialorder %v386_v24, 0.0 }
 0x112   : > { %v696_v35 = vpop.eup %695  ;;  %588 = vst [vmem:[%s164_s25] sm:$0xff] %v587_v30   ;;  %v406_v38 = vmul.f32 0.2, %v390_v27  ;;  %vm398_vm7 = vcmp.ge.f32.partialorder %v390_v27, 0.0 }
 0x113   : > { %v698_v36 = vpop.eup %697  ;;  %v387_v33 = vmul.f32 %v696_v35, %v312_v31  ;;  %605 = vst [vmem:[%s164_s25 + $0x10] sm:$0xff] %v597_v34   ;;  %v410_v43 = vsel %vm394_vm6, %v386_v24, %v402_v37 }
 0x114   : > { %v391_v39 = vmul.f32 %v698_v36, %v332_v32  ;;  %v414_v44 = vsel %vm398_vm7, %v390_v27, %v406_v38 }
 0x115   : > { %vm395_vm8 = vcmp.ge.f32.partialorder %v387_v33, 0.0  ;;  %v403_v42 = vmul.f32 0.2, %v387_v33 }
 0x116   : > { %vm399_vm9 = vcmp.ge.f32.partialorder %v391_v39, 0.0  ;;  %v407_v40 = vmul.f32 0.2, %v391_v39 }
 0x117   : > { %v411_v41 = vsel %vm395_vm8, %v387_v33, %v403_v42 }
 0x118   : > { %v415_v45 = vsel %vm399_vm9, %v391_v39, %v407_v40  ;;  %v592_v46 = vpack.c.bf16 %v411_v41, %v410_v43 }
 0x119   : > { %v602_v47 = vpack.c.bf16 %v415_v45, %v414_v44 }
 0x11a   : > { %604 = vst [vmem:[%s164_s25 + $0x8] sm:$0xff] %v592_v46  }
 0x11b   : > { %606 = vst [vmem:[%s164_s25 + $0x18] sm:$0xff] %v602_v47  }
 0x11c   : > { %712 = shalt.err (!%p709_p3)
}
 0x11d   : > { %s713_s8 = scalar_lea.hbm %s886_s30, 512  ;;  %s717_s11 = scalar_lea.hbm %s935_s3, 4096 }
 0x11e   : > { %p714_p4 = scmp.ne.s32.totalorder %s886_s30, %s713_s8  ;;  %p718_p9 = scmp.lt.s32.totalorder %s886_s30, %s935_s3 }
 0x11f   : > { %p719_p10 = scmp.lt.s32.totalorder %s717_s11, %s713_s8 }
 0x120   : > { %p715_p7 = pnand %p714_p4, %p823_p5 }
 0x121   : > { %p720_p11 = por %p719_p10, %p718_p9 }
 0x122   : > { %p716_p8 = pneg %p715_p7 }
 0x124   : > { %p721_p12 = pnand %p720_p11, %p716_p8 }
 0x126   : > { %724 = shalt.err (!%p721_p12)
}
 0x127   : > { %s763_s20 = smov 64   ;;  %s764_s24 = smov 4  }
 0x128   : > { %613 = dma.vmem_to_hbm [thread:$0]  (%p823_p5), %s888_s27, 512, %s886_s30, %s892_s16, %s763_s20, %s763_s20, %s764_s24  }
 0x129 PF: > { %p619_p13 = scmp.ge.s32.totalorder %s759_s15, 2  ;;  %s485_s25 = sand.u32 1, %s747_s12  }
 0x12a   : > { %s486_s26 = scalar_lea.sflag [#allocation3], %s485_s25 }
 0x12b   : > { %p616_p0 = pnand %p619_p13, %p827_p6 }
 0x12d   : > { %p617_p1 = pneg %p616_p0 }
 0x12f   : > { %742 = dma.done.wait (%p617_p1), %s486_s26, 512  }
 0x130   : > { %744 = vsyncadd (%p617_p1), %s486_s26, 4294966784  ;;  %p13_p2 = scmp.ge.s32.totalorder %s810_s18, 10   ;;  %s938_s12 = smov %s751_s13 }
 0x131   : > { %s939_s13 = smov %s755_s14  ;;  %s940_s14 = smov %s821_s21 }
 0x132   : > { %s941_s15 = smov %s810_s18  ;;  %15 = sbr.rel (!%p13_p2) target bundleno = 3 (0x3), region = 67 }
 0x137   :  { %491 = vsyncpa [#allocation3], 1 }
 0x138   :  { %493 = vsyncpa [#allocation3 + $0x1], 1 }

</bundles_post_ra>
